<compile_context>
chip_gen: v7x
topology: tpu7x:2x2x1
jax: 0.10.0
libtpu: 0.0.40
codegen_flags: <defaults>
</compile_context>

<pallas_src>
import functools
import math

import jax
import jax.numpy as jnp
from jax import lax
from jax.experimental import pallas as pl
from jax.experimental.pallas import tpu as pltpu


_DN_RHS_LAST = (((1,), (1,)), ((), ()))   # contract x dim 1 with w dim 1: x @ w.T
_VMEM_LIMIT = 32 * 1024 * 1024            # safe on v5e/v6e/v7x


def _pick_tile(n, candidates):
    for t in candidates:
        if n % t == 0:
            return t
    return n


# ------------------------- fused QKV projection kernels ----------------------
def _qkv_self_kernel(x_ref, w_ref, b_ref, q_ref, k_ref, v_ref):
    # x: (tm, d) f32; w: (3d, d) bf16 resident (rows = [Wq; Wk; Wv]); b: (1, 3d).
    d = q_ref.shape[1]
    acc = lax.dot_general(
        x_ref[...].astype(jnp.bfloat16), w_ref[...],
        dimension_numbers=_DN_RHS_LAST, preferred_element_type=jnp.float32)
    acc = acc + b_ref[...]
    q_ref[...] = acc[:, 0 * d:1 * d].astype(q_ref.dtype)
    k_ref[...] = acc[:, 1 * d:2 * d].astype(k_ref.dtype)
    v_ref[...] = acc[:, 2 * d:3 * d].astype(v_ref.dtype)


def pallas_qkv_self(x2d, w_qkv, b_qkv):
    """Self-attention path: one activation read, one stacked GEMM, bf16 q/k/v."""
    n, d = x2d.shape
    tm = _pick_tile(n, (512, 256, 128, 64, 32, 16, 8))
    flops = 2 * n * d * 3 * d
    bytes_accessed = n * d * 4 + 3 * d * d * 2 + 3 * d * 4 + 3 * n * d * 2
    out = jax.ShapeDtypeStruct((n, d), jnp.bfloat16)
    return pl.pallas_call(
        _qkv_self_kernel,
        out_shape=(out, out, out),
        grid=(n // tm,),
        in_specs=[
            pl.BlockSpec((tm, d), lambda i: (i, 0)),
            pl.BlockSpec((3 * d, d), lambda i: (0, 0)),   # resident bf16 weight
            pl.BlockSpec((1, 3 * d), lambda i: (0, 0)),   # resident f32 bias
        ],
        out_specs=(pl.BlockSpec((tm, d), lambda i: (i, 0)),) * 3,
        compiler_params=pltpu.CompilerParams(
            dimension_semantics=("parallel",),
            vmem_limit_bytes=_VMEM_LIMIT),
        cost_estimate=pl.CostEstimate(flops=flops, transcendentals=0,
                                      bytes_accessed=bytes_accessed),
    )(x2d, w_qkv, b_qkv)


def _qkv_cross_kernel(xq_ref, xk_ref, xv_ref, w_ref, b_ref, q_ref, k_ref, v_ref):
    # Three projections in one launch; per-projection static ref slices of the
    # resident stacked weight (zero-cost views).
    d = q_ref.shape[1]
    for idx, (x_ref, o_ref) in enumerate(
            ((xq_ref, q_ref), (xk_ref, k_ref), (xv_ref, v_ref))):
        lo = idx * d
        acc = lax.dot_general(
            x_ref[...].astype(jnp.bfloat16), w_ref[lo:lo + d, :],
            dimension_numbers=_DN_RHS_LAST, preferred_element_type=jnp.float32)
        o_ref[...] = (acc + b_ref[:, lo:lo + d]).astype(o_ref.dtype)


def pallas_qkv_cross(xq, xk, xv, w_qkv, b_qkv):
    """General (cross-attention) path: distinct q/k/v inputs, one launch."""
    n, d = xq.shape
    tm = _pick_tile(n, (512, 256, 128, 64, 32, 16, 8))
    flops = 2 * n * d * 3 * d
    bytes_accessed = 3 * n * d * 4 + 3 * d * d * 2 + 3 * d * 4 + 3 * n * d * 2
    out = jax.ShapeDtypeStruct((n, d), jnp.bfloat16)
    return pl.pallas_call(
        _qkv_cross_kernel,
        out_shape=(out, out, out),
        grid=(n // tm,),
        in_specs=[
            pl.BlockSpec((tm, d), lambda i: (i, 0)),
            pl.BlockSpec((tm, d), lambda i: (i, 0)),
            pl.BlockSpec((tm, d), lambda i: (i, 0)),
            pl.BlockSpec((3 * d, d), lambda i: (0, 0)),   # resident bf16 weight
            pl.BlockSpec((1, 3 * d), lambda i: (0, 0)),   # resident f32 bias
        ],
        out_specs=(pl.BlockSpec((tm, d), lambda i: (i, 0)),) * 3,
        compiler_params=pltpu.CompilerParams(
            dimension_semantics=("parallel",),
            vmem_limit_bytes=_VMEM_LIMIT),
        cost_estimate=pl.CostEstimate(flops=flops, transcendentals=0,
                                      bytes_accessed=bytes_accessed),
    )(xq, xk, xv, w_qkv, b_qkv)


# ---------------- attention kernel (with fused output projection) ------------
def _attn_kernel(vlen_ref, q_ref, k_ref, v_ref, wo_ref, bo_ref, o_ref, *,
                 n_heads):
    # q: (tq, d_model) bf16 (query-row tile); k/v: (S, d_model) bf16 (all keys);
    # wo: (d_model, d_model) bf16 resident; bo: (1, d_model) f32;
    # o: (tq, d_model) f32 (final projected output) -> lane-dense single store.
    b = pl.program_id(0)
    tq, d_model = q_ref.shape
    s_k = k_ref.shape[0]
    d_head = d_model // n_heads
    scale = jnp.float32(1.0 / math.sqrt(d_head))

    # Additive key mask shared by all heads: 0 where valid, -1e6 where padded
    # (d2l masked_softmax semantics).  One select total instead of one per head.
    vlen = vlen_ref[b]                                       # scalar (SMEM)
    col = lax.broadcasted_iota(jnp.int32, (1, s_k), 1)
    mask_add = jnp.where(col < vlen, jnp.float32(0.0), jnp.float32(-1e6))

    # Per-head ref slices (zero-cost views) keep live ranges bounded; n_heads is
    # a small static constant, so a static loop is fine here.
    # TODO(synk): move heads to a grid axis for large n_heads / long sequences.
    head_outs = []
    for h in range(n_heads):
        lo = h * d_head
        q = q_ref[:, lo:lo + d_head]                         # (tq, d_head) bf16
        k = k_ref[:, lo:lo + d_head]                         # (S,  d_head) bf16
        s = lax.dot_general(q, k, dimension_numbers=_DN_RHS_LAST,
                            preferred_element_type=jnp.float32) * scale
        s = s + mask_add                                     # broadcast add
        s = s - jnp.max(s, axis=-1, keepdims=True)
        p = jnp.exp(s)
        p = p * pl.reciprocal(jnp.sum(p, axis=-1, keepdims=True), approx=True)
        # dropout(p=0) is the identity (module default) -> omitted.
        v = v_ref[:, lo:lo + d_head]                         # (S, d_head) bf16
        head_outs.append(jnp.dot(p.astype(jnp.bfloat16), v,
                                 preferred_element_type=jnp.float32))

    # One lane-dense (tq, d_model) context slab (no sub-128-lane stores).
    ctx = jnp.concatenate(head_outs, axis=-1)

    # Fused output projection: out = ctx @ Wo^T + bo.  Saves a full
    # (bs, S, d_model) HBM write + read and a kernel launch.
    out = lax.dot_general(ctx.astype(jnp.bfloat16), wo_ref[...],
                          dimension_numbers=_DN_RHS_LAST,
                          preferred_element_type=jnp.float32) + bo_ref[...]
    o_ref[...] = out.astype(o_ref.dtype)


def pallas_attention(q, k, v, valid_len, wo_bf16, bo_f32, n_heads):
    # q/k/v: (bs, S, d_model) bf16; valid_len: (bs,) int32.
    bs, seq, d_model = q.shape
    tq = _pick_tile(seq, (256, 128, 64, 32, 16, 8))
    n_qt = seq // tq

    flops = bs * (4 * seq * seq * d_model + 2 * seq * d_model * d_model)
    transcendentals = bs * n_heads * seq * seq
    bytes_accessed = (bs * seq * d_model * 2                    # q (bf16)
                      + 2 * bs * n_qt * seq * d_model * 2       # k, v per q tile
                      + d_model * d_model * 2 + d_model * 4     # Wo, bo
                      + bs * seq * d_model * 4)                 # output (f32)

    kernel = functools.partial(_attn_kernel, n_heads=n_heads)
    return pl.pallas_call(
        kernel,
        out_shape=jax.ShapeDtypeStruct((bs, seq, d_model), jnp.float32),
        grid_spec=pltpu.PrefetchScalarGridSpec(
            num_scalar_prefetch=1,
            grid=(bs, n_qt),
            in_specs=[
                pl.BlockSpec((None, tq, d_model), lambda b, qi, vl: (b, qi, 0)),
                pl.BlockSpec((None, seq, d_model), lambda b, qi, vl: (b, 0, 0)),
                pl.BlockSpec((None, seq, d_model), lambda b, qi, vl: (b, 0, 0)),
                pl.BlockSpec((d_model, d_model), lambda b, qi, vl: (0, 0)),
                pl.BlockSpec((1, d_model), lambda b, qi, vl: (0, 0)),
            ],
            out_specs=pl.BlockSpec((None, tq, d_model),
                                   lambda b, qi, vl: (b, qi, 0)),
        ),
        compiler_params=pltpu.CompilerParams(
            dimension_semantics=("parallel", "parallel"),
            vmem_limit_bytes=_VMEM_LIMIT),
        cost_estimate=pl.CostEstimate(flops=flops,
                                      transcendentals=transcendentals,
                                      bytes_accessed=bytes_accessed),
    )(valid_len, q, k, v, wo_bf16, bo_f32)


# --------------------------- MultiHeadAttention --------------------------------
def init_mha_params(key, d_model):
    # 4x nn.Linear(d_model, d_model), torch default init (bias=True).
    params = []
    keys = jax.random.split(key, 8)
    bound = 1.0 / math.sqrt(d_model)
    for i in range(4):
        w = jax.random.uniform(keys[2 * i], (d_model, d_model),
                               jnp.float32, -bound, bound)
        b = jax.random.uniform(keys[2 * i + 1], (d_model,),
                               jnp.float32, -bound, bound)
        params.append((w, b))
    return params


def prepare_mha_params(params):
    """One-time conversion: stacked bf16 QKV weight + bf16 Wo (no per-call casts)."""
    (wq, bq), (wk, bk), (wv, bv), (wo, bo) = params
    d = wq.shape[0]
    w_qkv = jnp.concatenate([wq, wk, wv], axis=0).astype(jnp.bfloat16)   # (3d, d)
    b_qkv = jnp.concatenate([bq, bk, bv], axis=0).reshape(1, 3 * d)
    b_qkv = b_qkv.astype(jnp.float32)
    return (w_qkv, b_qkv,
            wo.astype(jnp.bfloat16),
            bo.reshape(1, d).astype(jnp.float32))


def multi_head_attention(prepared, query, key, value, valid_len, n_heads):
    bs, seq_len, d_model = query.shape
    assert key.shape == query.shape and value.shape == query.shape
    n = bs * seq_len
    w_qkv, b_qkv, wo_bf16, bo_f32 = prepared

    if (query is key) and (key is value):
        # Self-attention fast path: activation read from HBM once.
        q2, k2, v2 = pallas_qkv_self(query.reshape(n, d_model), w_qkv, b_qkv)
    else:
        q2, k2, v2 = pallas_qkv_cross(
            query.reshape(n, d_model), key.reshape(n, d_model),
            value.reshape(n, d_model), w_qkv, b_qkv)

    q3 = q2.reshape(bs, seq_len, d_model)
    k3 = k2.reshape(bs, seq_len, d_model)
    v3 = v2.reshape(bs, seq_len, d_model)

    if valid_len is None:
        vlen = jnp.full((bs,), seq_len, dtype=jnp.int32)
    else:
        vlen = valid_len.astype(jnp.int32)                  # (bs,), no repeat

    # Attention + output projection fused in one kernel.
    return pallas_attention(q3, k3, v3, vlen, wo_bf16, bo_f32, n_heads)


# --------------------------- pure-JAX reference --------------------------------
def reference_mha(params, query, key, value, valid_len, n_heads):
    bs, seq, d_model = query.shape
    d_head = d_model // n_heads

    def lin(layer, x):
        w, b = layer
        return x @ w.T + b

    def split_heads(x):
        x = x.reshape(bs, seq, n_heads, d_head).transpose(0, 2, 1, 3)
        return x.reshape(bs * n_heads, seq, d_head)

    q = split_heads(lin(params[0], query))
    k = split_heads(lin(params[1], key))
    v = split_heads(lin(params[2], value))
    scores = jnp.einsum("bqd,bkd->bqk", q, k) / math.sqrt(d_head)
    vl = jnp.repeat(valid_len.astype(jnp.int32), n_heads, axis=0)
    col = jnp.arange(seq)[None, None, :]
    scores = jnp.where(col < vl[:, None, None], scores, -1e6)
    p = jax.nn.softmax(scores, axis=-1)
    o = jnp.einsum("bqk,bkd->bqd", p, v)
    o = o.reshape(bs, n_heads, seq, d_head).transpose(0, 2, 1, 3)
    o = o.reshape(bs, seq, d_model)
    return lin(params[3], o)


if __name__ == "__main__":
    bs, seq_len, d_model, n_heads = 2, 8, 32, 4

    root = jax.random.PRNGKey(0)
    k_params, k_q, k_k, k_v = jax.random.split(root, 4)

    params = init_mha_params(k_params, d_model)
    prepared = prepare_mha_params(params)                # bf16 weights, once
    valid_len = jnp.array([3, 6], dtype=jnp.int32)       # per-batch valid key len

    # 1) self-attention path (query is key is value -> single-read fused QKV)
    x = jax.random.normal(k_q, (bs, seq_len, d_model), jnp.float32)
    out_self = multi_head_attention(prepared, x, x, x, valid_len, n_heads)
    jax.block_until_ready(out_self)

    # 2) general path (distinct query / key / value -> fused-projection kernel)
    query = jax.random.normal(k_q, (bs, seq_len, d_model), jnp.float32)
    key = jax.random.normal(k_k, (bs, seq_len, d_model), jnp.float32)
    value = jax.random.normal(k_v, (bs, seq_len, d_model), jnp.float32)
    out_cross = multi_head_attention(prepared, query, key, value,
                                     valid_len, n_heads)
    jax.block_until_ready(out_cross)

    # correctness vs. pure-JAX f32 reference (loose tol: bf16 MXU + approx recip)
    ref_self = reference_mha(params, x, x, x, valid_len, n_heads)
    ref_cross = reference_mha(params, query, key, value, valid_len, n_heads)

    for out, ref in ((out_self, ref_self), (out_cross, ref_cross)):
        assert out.shape == (bs, seq_len, d_model)
        assert jnp.all(jnp.isfinite(out))
        assert float(jnp.max(jnp.abs(out - ref))) < 0.1

    print("KERNEL_OK")
</pallas_src>

<mosaic_0001>
module attributes {stable_mosaic.version = 11 : i64} {
  func.func @_qkv_self_kernel(%arg0: i32, %arg1: memref<16x32xf32, #tpu.memory_space<vmem>>, %arg2: memref<96x32xbf16, #tpu.memory_space<vmem>>, %arg3: memref<1x96xf32, #tpu.memory_space<vmem>>, %arg4: memref<16x32xbf16, #tpu.memory_space<vmem>>, %arg5: memref<16x32xbf16, #tpu.memory_space<vmem>>, %arg6: memref<16x32xbf16, #tpu.memory_space<vmem>>) attributes {dimension_semantics = [#tpu.dimension_semantics<parallel>], iteration_bounds = array<i64: 1>, scalar_prefetch = 0 : i64, scratch_operands = 0 : i64, tpu.core_type = #tpu.core_type<tc>, window_params = [{transform_indices = @transform_0, window_bounds = array<i64: 16, 32>}, {pipeline_mode = #tpu.pipeline_mode<synchronous>, transform_indices = @transform_1, window_bounds = array<i64: 96, 32>}, {pipeline_mode = #tpu.pipeline_mode<synchronous>, transform_indices = @transform_2, window_bounds = array<i64: 1, 96>}, {transform_indices = @transform_3, window_bounds = array<i64: 16, 32>}, {transform_indices = @transform_4, window_bounds = array<i64: 16, 32>}, {transform_indices = @transform_5, window_bounds = array<i64: 16, 32>}]} {
    %c0 = arith.constant 0 : index
    %c0_0 = arith.constant 0 : index
    %0 = vector.load %arg1[%c0, %c0_0] : memref<16x32xf32, #tpu.memory_space<vmem>>, vector<16x32xf32>
    %1 = arith.truncf %0 : vector<16x32xf32> to vector<16x32xbf16>
    %c0_1 = arith.constant 0 : index
    %c0_2 = arith.constant 0 : index
    %2 = vector.load %arg2[%c0_1, %c0_2] : memref<96x32xbf16, #tpu.memory_space<vmem>>, vector<96x32xbf16>
    %cst = arith.constant dense<0.000000e+00> : vector<16x96xf32>
    %3 = tpu.matmul %1, %2, %cst {dimension_numbers = #tpu.dot_dimension_numbers<[1], [1], [0], [0], [0, 0, 1, 0], [], []>} : vector<16x32xbf16>, vector<96x32xbf16>, vector<16x96xf32> -> vector<16x96xf32>
    %c0_3 = arith.constant 0 : index
    %c0_4 = arith.constant 0 : index
    %4 = vector.load %arg3[%c0_3, %c0_4] : memref<1x96xf32, #tpu.memory_space<vmem>>, vector<1x96xf32>
    %5 = vector.broadcast %4 : vector<1x96xf32> to vector<16x96xf32>
    %6 = arith.addf %3, %5 : vector<16x96xf32>
    %7 = vector.extract_strided_slice %6 {offsets = [0, 0], sizes = [16, 32], strides = [1, 1]} : vector<16x96xf32> to vector<16x32xf32>
    %8 = arith.truncf %7 : vector<16x32xf32> to vector<16x32xbf16>
    %c0_5 = arith.constant 0 : index
    %c0_6 = arith.constant 0 : index
    %9 = vector.load %arg4[%c0_5, %c0_6] : memref<16x32xbf16, #tpu.memory_space<vmem>>, vector<16x32xbf16>
    tpu.vector_store %arg4[%c0_5, %c0_6], %8 {strides = array<i32>} : memref<16x32xbf16, #tpu.memory_space<vmem>>, vector<16x32xbf16>,
    %10 = vector.extract_strided_slice %6 {offsets = [0, 32], sizes = [16, 32], strides = [1, 1]} : vector<16x96xf32> to vector<16x32xf32>
    %11 = arith.truncf %10 : vector<16x32xf32> to vector<16x32xbf16>
    %c0_7 = arith.constant 0 : index
    %c0_8 = arith.constant 0 : index
    %12 = vector.load %arg5[%c0_7, %c0_8] : memref<16x32xbf16, #tpu.memory_space<vmem>>, vector<16x32xbf16>
    tpu.vector_store %arg5[%c0_7, %c0_8], %11 {strides = array<i32>} : memref<16x32xbf16, #tpu.memory_space<vmem>>, vector<16x32xbf16>,
    %13 = vector.extract_strided_slice %6 {offsets = [0, 64], sizes = [16, 32], strides = [1, 1]} : vector<16x96xf32> to vector<16x32xf32>
    %14 = arith.truncf %13 : vector<16x32xf32> to vector<16x32xbf16>
    %c0_9 = arith.constant 0 : index
    %c0_10 = arith.constant 0 : index
    %15 = vector.load %arg6[%c0_9, %c0_10] : memref<16x32xbf16, #tpu.memory_space<vmem>>, vector<16x32xbf16>
    tpu.vector_store %arg6[%c0_9, %c0_10], %14 {strides = array<i32>} : memref<16x32xbf16, #tpu.memory_space<vmem>>, vector<16x32xbf16>,
    return
  }
  func.func @transform_0(%arg0: i32) -> (i32, i32) {
    %c0_i32 = arith.constant 0 : i32
    %c0_i32_0 = arith.constant 0 : i32
    return %arg0, %c0_i32 : i32, i32
  }
  func.func @transform_1(%arg0: i32) -> (i32, i32) {
    %c0_i32 = arith.constant 0 : i32
    %c0_i32_0 = arith.constant 0 : i32
    %c0_i32_1 = arith.constant 0 : i32
    return %c0_i32, %c0_i32_0 : i32, i32
  }
  func.func @transform_2(%arg0: i32) -> (i32, i32) {
    %c0_i32 = arith.constant 0 : i32
    %c0_i32_0 = arith.constant 0 : i32
    %c0_i32_1 = arith.constant 0 : i32
    return %c0_i32, %c0_i32_0 : i32, i32
  }
  func.func @transform_3(%arg0: i32) -> (i32, i32) {
    %c0_i32 = arith.constant 0 : i32
    %c0_i32_0 = arith.constant 0 : i32
    return %arg0, %c0_i32 : i32, i32
  }
  func.func @transform_4(%arg0: i32) -> (i32, i32) {
    %c0_i32 = arith.constant 0 : i32
    %c0_i32_0 = arith.constant 0 : i32
    return %arg0, %c0_i32 : i32, i32
  }
  func.func @transform_5(%arg0: i32) -> (i32, i32) {
    %c0_i32 = arith.constant 0 : i32
    %c0_i32_0 = arith.constant 0 : i32
    return %arg0, %c0_i32 : i32, i32
  }
}

</mosaic_0001>

<bundles_post_ra>
// kernel: tpu_custom_call.1
= control target key start
LH: loop header
LB: loop body
LE: loop exit
PB: predicated region body
PF: predicated region fallthrough
CT: control target
= control target key end

     0   :  { %11 = vsyncpa [#allocation3], 0  ;;  %v328_v1 = vmov 0.0   ;;  %vm72_vm0 = vcmask 261120   ;;  %vm329_vm1 = vmmov 0   ;;  %s460_s0 = inlined_call_operand.vmem [shape: f32[16,32], index: 0, kind: input, shape index: {}]   ;;  %s461_s1 = inlined_call_operand.vmem [shape: bf16[96,32], index: 1, kind: input, shape index: {}]   ;;  %s462_s2 = inlined_call_operand.vmem [shape: f32[1,96], index: 2, kind: input, shape index: {}]   ;;  %s463_s3 = inlined_call_operand.hbm [shape: bf16[16,32], index: 3, kind: output, shape index: {0}]   ;;  %s464_s4 = inlined_call_operand.hbm [shape: bf16[16,32], index: 4, kind: output, shape index: {1}]   ;;  %s465_s5 = inlined_call_operand.hbm [shape: bf16[16,32], index: 5, kind: output, shape index: {2}]  }
   0x1   :  { %v252_v0 = vld [vmem:[%s461_s1] sm:$0xff]   ;;  %228 = vmatprep.subr.bf16.mxu0 %v328_v1  ;;  %v253_v3 = vld [vmem:[%s461_s1 + $0x8] sm:$0xff]   ;;  %240 = vmatprep.mubr.msk.bf16.mxu0 %vm329_vm1, %v328_v1 }
   0x2   :  { %v77_v2 = vsel %vm72_vm0, %v252_v0, 0 }
   0x3   :  { %229 = vmatpush3.bf16.xpose.msra.mxu0 %v77_v2 }
   0x4   :  { %230 = vmatprep.subr.bf16.mxu0 %v328_v1 }
   0x5   :  { %12 = vsyncpa [#allocation5], 0  ;;  %v80_v4 = vsel %vm72_vm0, %v253_v3, 0  ;;  %v254_v5 = vld [vmem:[%s461_s1 + $0x10] sm:$0xff]   ;;  %v255_v7 = vld [vmem:[%s461_s1 + $0x18] sm:$0xff]   ;;  %vm143_vm2 = vcmask 257024  }
   0x6   :  { %v83_v6 = vsel %vm72_vm0, %v254_v5, 0  ;;  %v86_v8 = vsel %vm72_vm0, %v255_v7, 0  ;;  %v256_v9 = vld [vmem:[%s461_s1 + $0x20] sm:$0xff]   ;;  %v257_v11 = vld [vmem:[%s461_s1 + $0x28] sm:$0xff]   ;;  %s330_s1 = smov [#allocation2]   ;;  %s332_s12 = smov 96  }
   0x7   :  { %v89_v10 = vsel %vm72_vm0, %v256_v9, 0  ;;  %v92_v12 = vsel %vm72_vm0, %v257_v11, 0  ;;  %v20_v13 = vld [vmem:[%s460_s0] sm:$0xff]  ;;  %v21_v14 = vld [vmem:[%s460_s0 + $0x8] sm:$0xff]  ;;  %s167_s11 = sshll.u32 %s330_s1, 4  ;;  %s331_s0 = smov 64   ;;  %s168_s11 = int_to_ptr.vmem [resolvable:$true] %s167_s11 }
   0x8   :  { %v22_v15 = vpack.c.bf16 %v21_v14, %v20_v13  ;;  %v209_v16 = vld [vmem:[%s462_s2] ss:$0 sm:$0xff]  ;;  %s258_s2 = scalar_lea.vmem %s168_s11, 128  ;;  %p263_p1 = scmp.lt.s32.totalorder %s168_s11, %s168_s11 }
   0x9   :  { %p259_p0 = scmp.ne.s32.totalorder %s168_s11, %s258_s2  ;;  %p264_p2 = scmp.lt.s32.totalorder %s258_s2, %s258_s2 }
   0xb   :  { %231 = vmatpush3.bf16.xpose.msra.mxu0 %v80_v4  ;;  %p265_p3 = por %p264_p2, %p263_p1 }
   0xc   :  { %232 = vmatprep.subr.bf16.mxu0 %v328_v1 }
   0xd   :  { %p266_p4 = pnand %p265_p3, %p259_p0 }
  0x13   :  { %233 = vmatpush3.bf16.xpose.msra.mxu0 %v83_v6 }
  0x14   :  { %234 = vmatprep.subr.bf16.mxu0 %v328_v1 }
  0x1b   :  { %235 = vmatpush3.bf16.xpose.msra.mxu0 %v86_v8 }
  0x1c   :  { %236 = vmatprep.subr.bf16.mxu0 %v328_v1 }
  0x23   :  { %237 = vmatpush3.bf16.xpose.msra.mxu0 %v89_v10 }
  0x24   :  { %238 = vmatprep.subr.bf16.mxu0 %v328_v1 }
  0x2b   :  { %239 = vmatpush3.bf16.xpose.msra.mxu0 %v92_v12 }
  0x32   :  { %241 = vmatmul.mubr.msk.bf16.vlgmr.msra.gmra.mrb[0].mxu0 %vm72_vm0, %v22_v15 }
 0x105   :  { %v128_v17 = vpop.f32.mrb[0].mxu0 }
 0x106   :  { %v129_v18 = vadd.f32 %v209_v16, %v128_v17  ;;  %v242_v19 = vpop.f32.mrb[1].mxu0 }
 0x107   :  { %v131_v20 = vpop.f32.mrb[2].mxu0 }
 0x108   :  { %v219_v21 = vpack.c.bf16 %v129_v18, %v129_v18  ;;  %v132_v22 = vadd.f32 %v209_v16, %v131_v20  ;;  %v243_v23 = vpop.f32.mrb[3].mxu0 }
 0x10a   :  { %144 = vst.msk [vmem:[#allocation2] sm:$0xf] %vm143_vm2, %v219_v21  ;;  %v220_v24 = vpack.c.bf16 %v132_v22, %v132_v22  ;;  %154 = vrot.lane.b32.xlu1 %v219_v21, %s331_s0  ;;  %146 = vrot.lane.b32.xlu0 %v219_v21, %s332_s12 }
 0x10c   :  { %145 = vst.msk [vmem:[#allocation2 + $0x4] sm:$0xf] %vm143_vm2, %v220_v24 }
 0x10d   :  { %269 = shalt.err (!%p266_p4)
}
 0x10e   :  { %s270_s15 = scalar_lea.hbm %s463_s3, 128 }
 0x10f   :  { %p271_p5 = scmp.ne.s32.totalorder %s463_s3, %s270_s15  ;;  %p274_p6 = scmp.lt.u32.totalorder %s270_s15, %s463_s3 }
 0x111   :  { %p276_p7 = pnand %p274_p6, %p271_p5 }
 0x113   :  { %279 = shalt.err (!%p276_p7)
}
 0x114   :  { %s333_s20 = smov 4   ;;  %156 = vrot.lane.b32.xlu1 %v220_v24, %s331_s0  ;;  %148 = vrot.lane.b32.xlu0 %v220_v24, %s332_s12  ;;  %s334_s23 = smov [#allocation4]  }
 0x115   :  { %173 = dma.vmem_to_hbm [thread:$0]  %s168_s11, 128, %s463_s3, [#allocation3], %s331_s0, %s331_s0, %s333_s20  }
 0x116   :  { %s179_s24 = sshll.u32 %s334_s23, 4  ;;  %s335_s25 = smov [#allocation6]   ;;  %s180_s24 = int_to_ptr.vmem [resolvable:$true] %s179_s24 }
 0x117   :  { %s191_s26 = sshll.u32 %s335_s25, 4  ;;  %s280_s3 = scalar_lea.vmem %s180_s24, 128  ;;  %s421_s26 = int_to_ptr.vmem [resolvable:$true] %s191_s26 }
 0x118   :  { %p281_p8 = scmp.ne.s32.totalorder %s180_s24, %s280_s3  ;;  %p285_p9 = scmp.lt.s32.totalorder %s180_s24, %s180_s24 }
 0x119   :  { %p286_p10 = scmp.lt.s32.totalorder %s280_s3, %s280_s3 }
 0x11b   :  { %p287_p11 = por %p286_p10, %p285_p9 }
 0x11d   :  { %p288_p12 = pnand %p287_p11, %p281_p8 }
 0x17c   :  { %v155_v25 = vpop.permute.xlu1 %154  ;;  %v147_v26 = vpop.permute.xlu0 %146 }
 0x17d   :  { %160 = vst.msk [vmem:[#allocation6] sm:$0xf] %vm143_vm2, %v155_v25  ;;  %152 = vst.msk [vmem:[#allocation4] sm:$0xf] %vm143_vm2, %v147_v26 }
 0x186   :  { %v157_v27 = vpop.permute.xlu1 %156  ;;  %v149_v28 = vpop.permute.xlu0 %148 }
 0x187   :  { %161 = vst.msk [vmem:[#allocation6 + $0x4] sm:$0xf] %vm143_vm2, %v157_v27  ;;  %153 = vst.msk [vmem:[#allocation4 + $0x4] sm:$0xf] %vm143_vm2, %v149_v28 }
 0x188   :  { %291 = shalt.err (!%p288_p12)
}
 0x189   :  { %s292_s29 = scalar_lea.hbm %s464_s4, 128 }
 0x18a   :  { %p293_p13 = scmp.ne.s32.totalorder %s464_s4, %s292_s29  ;;  %p296_p0 = scmp.lt.u32.totalorder %s292_s29, %s464_s4 }
 0x18c   :  { %p298_p1 = pnand %p296_p0, %p293_p13 }
 0x18e   :  { %301 = shalt.err (!%p298_p1)
}
 0x18f   :  { %185 = dma.vmem_to_hbm [thread:$0]  %s180_s24, 128, %s464_s4, [#allocation5], %s331_s0, %s331_s0, %s333_s20  }
 0x190   :  { %s302_s1 = scalar_lea.vmem %s421_s26, 128  ;;  %p307_p3 = scmp.lt.s32.totalorder %s421_s26, %s421_s26 }
 0x191   :  { %p303_p2 = scmp.ne.s32.totalorder %s421_s26, %s302_s1  ;;  %p308_p4 = scmp.lt.s32.totalorder %s302_s1, %s302_s1 }
 0x193   :  { %p309_p5 = por %p308_p4, %p307_p3 }
 0x195   :  { %p310_p6 = pnand %p309_p5, %p303_p2 }
 0x197   :  { %313 = shalt.err (!%p310_p6)
}
 0x198   :  { %s314_s2 = scalar_lea.hbm %s465_s5, 128 }
 0x199   :  { %p315_p7 = scmp.ne.s32.totalorder %s465_s5, %s314_s2  ;;  %p318_p8 = scmp.lt.u32.totalorder %s314_s2, %s465_s5 }
 0x19b   :  { %p320_p9 = pnand %p318_p8, %p315_p7 }
 0x19d   :  { %323 = shalt.err (!%p320_p9)
}
 0x19e   :  { %197 = dma.vmem_to_hbm [thread:$0]  %s421_s26, 128, %s465_s5, [#allocation5], %s331_s0, %s331_s0, %s333_s20  }
 0x19f   :  { %324 = dma.done.wait [#allocation3], 128  }
 0x1a0   :  { %325 = vsyncadd [#allocation3], 4294967168 }
 0x1a1   :  { %326 = dma.done.wait [#allocation5], 256  }
 0x1a2   :  { %327 = vsyncadd [#allocation5], 4294967040 }
 0x1a3   :  { %207 = vsyncpa [#allocation3], 1 }
 0x1a4   :  { %208 = vsyncpa [#allocation5], 1 }

</bundles_post_ra>
